<compile_context>
chip_gen: v7x
topology: tpu7x:2x2x1
jax: 0.10.0
libtpu: 0.0.40
codegen_flags: <defaults>
</compile_context>

<pallas_src>
import functools
import math

import jax
import jax.numpy as jnp
from jax import lax
from jax.experimental import pallas as pl
from jax.experimental.pallas import tpu as pltpu


# ----------------------------------------------------------------------------
# Generation-aware VMEM budget & tiling helpers
# ----------------------------------------------------------------------------
@functools.lru_cache(maxsize=None)
def _vmem_limit_bytes():
    """~75% of physical VMEM (headroom for compiler scratch / double buffers).

    ≈96 MiB on v5e/v6e (128 MiB VMEM), ≈48 MiB on v7x (64 MiB VMEM).
    """
    cap = 64 * 1024 * 1024
    try:
        info = pltpu.get_tpu_info()
        cap = int(getattr(info, "vmem_capacity_bytes", cap) or cap)
    except Exception:
        pass
    return int(cap * 3 // 4)


@functools.lru_cache(maxsize=None)
def _tile_target():
    # Bigger tiles on 128 MiB parts: fewer ~0.35us grid steps, better DMA
    # amortization (matters most on v5e's lower HBM bandwidth).
    return 768 if _vmem_limit_bytes() >= 80 * 1024 * 1024 else 512


def _sublane_granule(*dtypes):
    """dtype-aware sublane granule: 8 (f32), 16 (bf16), 32 (int8)."""
    g = 8
    for dt in dtypes:
        g = max(g, 32 // max(1, jnp.dtype(dt).itemsize))
    return g


def _pick_tile(dim, target, granule):
    """Largest tile <= target that is a multiple of `granule` and divides dim.

    Small / awkward dims fall back to the full dimension (allowed by the
    "block == full array dim" escape of the (8,128) rule), but a huge
    non-divisible dim fails loudly instead of silently busting the VMEM
    budget.  TODO(synk): auto-pad ragged row dims instead of raising.
    """
    if dim <= target:
        return dim
    t = (target // granule) * granule
    while t >= granule:
        if dim % t == 0:
            return t
        t -= granule
    if dim <= 4 * target:
        return dim
    raise ValueError(
        f"No tile with granularity {granule} divides dim={dim}; pad the "
        f"input to a multiple of {granule}.")


# ----------------------------------------------------------------------------
# Tiled projection matmuls: plain, +bias, and fused K/V (shared x tile)
# ----------------------------------------------------------------------------
def _matmul_kernel(x_ref, w_ref, o_ref, acc_ref):
    @pl.when(pl.program_id(2) == 0)
    def _init():
        acc_ref[...] = jnp.zeros_like(acc_ref)

    acc_ref[...] += jnp.dot(
        x_ref[...], w_ref[...], preferred_element_type=jnp.float32
    )

    @pl.when(pl.program_id(2) == pl.num_programs(2) - 1)
    def _fin():
        o_ref[...] = acc_ref[...].astype(o_ref.dtype)


def _matmul_bias_kernel(x_ref, w_ref, b_ref, o_ref, acc_ref):
    @pl.when(pl.program_id(2) == 0)
    def _init():
        acc_ref[...] = jnp.zeros_like(acc_ref)

    acc_ref[...] += jnp.dot(
        x_ref[...], w_ref[...], preferred_element_type=jnp.float32
    )

    @pl.when(pl.program_id(2) == pl.num_programs(2) - 1)
    def _fin():
        o_ref[...] = (acc_ref[...] + b_ref[...].astype(jnp.float32)).astype(
            o_ref.dtype
        )


def _matmul_kv_kernel(x_ref, wk_ref, wv_ref, ko_ref, vo_ref, acck_ref, accv_ref):
    """Two GEMMs sharing one streamed x tile (halves x HBM reads)."""
    @pl.when(pl.program_id(2) == 0)
    def _init():
        acck_ref[...] = jnp.zeros_like(acck_ref)
        accv_ref[...] = jnp.zeros_like(accv_ref)

    x = x_ref[...]
    acck_ref[...] += jnp.dot(x, wk_ref[...], preferred_element_type=jnp.float32)
    accv_ref[...] += jnp.dot(x, wv_ref[...], preferred_element_type=jnp.float32)

    @pl.when(pl.program_id(2) == pl.num_programs(2) - 1)
    def _fin():
        ko_ref[...] = acck_ref[...].astype(ko_ref.dtype)
        vo_ref[...] = accv_ref[...].astype(vo_ref.dtype)


def _matmul_tiles(M, N, K, x_dtype, out_dtype):
    target = _tile_target()
    gran_m = _sublane_granule(x_dtype, out_dtype)
    tm = _pick_tile(M, target, gran_m)
    tn = _pick_tile(N, target, 128)
    tk = _pick_tile(K, target, 128)
    return tm, tn, tk


def pallas_matmul(x, w, bias=None, out_dtype=None):
    """(M, K) @ (K, N) [+ bias] -> (M, N), K-tiled with f32 accumulation."""
    M, K = x.shape
    K2, N = w.shape
    assert K == K2
    out_dtype = out_dtype or x.dtype
    tm, tn, tk = _matmul_tiles(M, N, K, x.dtype, out_dtype)
    grid = (M // tm, N // tn, K // tk)

    in_specs = [
        pl.BlockSpec((tm, tk), lambda i, j, k: (i, k)),
        pl.BlockSpec((tk, tn), lambda i, j, k: (k, j)),
    ]
    args = (x, w)
    kernel = _matmul_kernel
    if bias is not None:
        in_specs.append(pl.BlockSpec((1, tn), lambda i, j, k: (0, j)))
        args = (x, w, bias.reshape(1, N))
        kernel = _matmul_bias_kernel

    itemsize = jnp.dtype(x.dtype).itemsize
    cost = pl.CostEstimate(
        flops=2 * M * N * K,
        transcendentals=0,
        bytes_accessed=(M * K + K * N) * itemsize
        + M * N * jnp.dtype(out_dtype).itemsize,
    )

    return pl.pallas_call(
        kernel,
        out_shape=jax.ShapeDtypeStruct((M, N), out_dtype),
        grid_spec=pltpu.PrefetchScalarGridSpec(
            num_scalar_prefetch=0,
            grid=grid,
            in_specs=in_specs,
            out_specs=pl.BlockSpec((tm, tn), lambda i, j, k: (i, j)),
            scratch_shapes=[pltpu.VMEM((tm, tn), jnp.float32)],
        ),
        compiler_params=pltpu.CompilerParams(
            dimension_semantics=("parallel", "parallel", "arbitrary"),
            vmem_limit_bytes=_vmem_limit_bytes(),
        ),
        cost_estimate=cost,
    )(*args)


def pallas_matmul_kv(x, w_k, w_v, out_dtype=None):
    """Fused K/V projection: x @ w_k and x @ w_v sharing the x tile DMA."""
    M, K = x.shape
    K2, N = w_k.shape
    assert K == K2 and w_v.shape == (K, N)
    out_dtype = out_dtype or x.dtype
    tm, tn, tk = _matmul_tiles(M, N, K, x.dtype, out_dtype)
    grid = (M // tm, N // tn, K // tk)

    itemsize = jnp.dtype(x.dtype).itemsize
    cost = pl.CostEstimate(
        flops=4 * M * N * K,
        transcendentals=0,
        bytes_accessed=(M * K + 2 * K * N) * itemsize
        + 2 * M * N * jnp.dtype(out_dtype).itemsize,
    )
    out_spec = pl.BlockSpec((tm, tn), lambda i, j, k: (i, j))

    return pl.pallas_call(
        _matmul_kv_kernel,
        out_shape=(
            jax.ShapeDtypeStruct((M, N), out_dtype),
            jax.ShapeDtypeStruct((M, N), out_dtype),
        ),
        grid_spec=pltpu.PrefetchScalarGridSpec(
            num_scalar_prefetch=0,
            grid=grid,
            in_specs=[
                pl.BlockSpec((tm, tk), lambda i, j, k: (i, k)),
                pl.BlockSpec((tk, tn), lambda i, j, k: (k, j)),
                pl.BlockSpec((tk, tn), lambda i, j, k: (k, j)),
            ],
            out_specs=[out_spec, out_spec],
            scratch_shapes=[
                pltpu.VMEM((tm, tn), jnp.float32),
                pltpu.VMEM((tm, tn), jnp.float32),
            ],
        ),
        compiler_params=pltpu.CompilerParams(
            dimension_semantics=("parallel", "parallel", "arbitrary"),
            vmem_limit_bytes=_vmem_limit_bytes(),
        ),
        cost_estimate=cost,
    )(x, w_k, w_v)


# ----------------------------------------------------------------------------
# Flash-style attention core.
#   grid = (B, Nq-tiles, Nkv-tiles); KV axis innermost ("arbitrary").
#   Inputs/outputs stay in the PyTorch 'b n (h d)' layout (lane-dense slabs,
#   no wrapper-side head split/merge transposes).  Scale is pre-folded into
#   the Q weight; normalization happens once on the (tq, inner) accumulator.
# ----------------------------------------------------------------------------
def _flash_attention_kernel(q_ref, k_ref, v_ref, o_ref, m_ref, l_ref, acc_ref,
                            *, heads, dim_head):
    j = pl.program_id(2)

    @pl.when(j == 0)
    def _init():
        m_ref[...] = jnp.full_like(m_ref, -jnp.inf)
        l_ref[...] = jnp.zeros_like(l_ref)
        acc_ref[...] = jnp.zeros_like(acc_ref)

    q = q_ref[0]  # (tq,  H*Dh) — softmax scale already folded into w_q
    k = k_ref[0]  # (tkv, H*Dh)
    v = v_ref[0]  # (tkv, H*Dh)

    # Static per-head unroll.  Each head's PV product goes straight into its
    # lane offset of the f32 accumulator scratch (no concatenate, minimal
    # live f32 state).  TODO(synk): when dim_head % 128 == 0, move heads onto
    # the grid ((1, tq, dim_head) blocks) to drop the lane slicing entirely
    # and feed the MXU with back-to-back per-head matmuls.
    for h in range(heads):
        sl = slice(h * dim_head, (h + 1) * dim_head)
        q_h = q[:, sl]
        k_h = k[:, sl]
        v_h = v[:, sl]

        # QK^T contracting on the last dims — no k.T materialization.
        s = lax.dot_general(
            q_h, k_h,
            dimension_numbers=(((1,), (1,)), ((), ())),
            preferred_element_type=jnp.float32,
        )  # (tq, tkv) f32

        m_prev = m_ref[h]                                   # (tq, 1)
        m_new = jnp.maximum(m_prev, jnp.max(s, axis=-1, keepdims=True))
        alpha = jnp.exp(m_prev - m_new)                     # (tq, 1)
        p = jnp.exp(s - m_new)                              # (tq, tkv) f32

        l_ref[h] = alpha * l_ref[h] + jnp.sum(p, axis=-1, keepdims=True)
        acc_ref[:, sl] = alpha * acc_ref[:, sl] + jnp.dot(
            p.astype(v_h.dtype), v_h, preferred_element_type=jnp.float32
        )
        m_ref[h] = m_new

    @pl.when(j == pl.num_programs(2) - 1)
    def _fin():
        # Normalize the (tq, Dh) accumulator (not the (tq, tkv) probabilities);
        # EUP approx reciprocal runs in a free slot.
        for h in range(heads):
            sl = slice(h * dim_head, (h + 1) * dim_head)
            acc_ref[:, sl] = acc_ref[:, sl] * pl.reciprocal(
                l_ref[h], approx=True
            )
        # Single lane-dense store of the whole 'n (h d)' slab.
        o_ref[0] = acc_ref[...].astype(o_ref.dtype)


def pallas_attention(q, k, v, *, heads, dim_head):
    """q: (B, Nq, H*Dh), k/v: (B, Nkv, H*Dh) -> (B, Nq, H*Dh) ('b n (h d)')."""
    B, Nq, inner = q.shape
    _, Nkv, _ = k.shape
    assert inner == heads * dim_head

    gran = _sublane_granule(q.dtype)
    target = _tile_target()
    tq = _pick_tile(Nq, max(gran, target // 2), gran)
    tkv = _pick_tile(Nkv, target, gran)
    grid = (B, Nq // tq, Nkv // tkv)

    itemsize = jnp.dtype(q.dtype).itemsize
    cost = pl.CostEstimate(
        flops=4 * B * heads * Nq * Nkv * dim_head,
        transcendentals=B * heads * Nq * Nkv,
        bytes_accessed=(B * Nq * inner * 2 + B * Nkv * inner * 2) * itemsize,
    )

    return pl.pallas_call(
        functools.partial(
            _flash_attention_kernel, heads=heads, dim_head=dim_head
        ),
        out_shape=jax.ShapeDtypeStruct((B, Nq, inner), q.dtype),
        grid_spec=pltpu.PrefetchScalarGridSpec(
            num_scalar_prefetch=0,
            grid=grid,
            in_specs=[
                pl.BlockSpec((1, tq, inner), lambda b, i, j: (b, i, 0)),
                pl.BlockSpec((1, tkv, inner), lambda b, i, j: (b, j, 0)),
                pl.BlockSpec((1, tkv, inner), lambda b, i, j: (b, j, 0)),
            ],
            out_specs=pl.BlockSpec((1, tq, inner), lambda b, i, j: (b, i, 0)),
            scratch_shapes=[
                pltpu.VMEM((heads, tq, 1), jnp.float32),   # running max
                pltpu.VMEM((heads, tq, 1), jnp.float32),   # running sum
                pltpu.VMEM((tq, inner), jnp.float32),      # output accumulator
            ],
        ),
        compiler_params=pltpu.CompilerParams(
            dimension_semantics=("parallel", "parallel", "arbitrary"),
            vmem_limit_bytes=_vmem_limit_bytes(),
        ),
        cost_estimate=cost,
    )(q, k, v)


# ----------------------------------------------------------------------------
# CrossAttention forward (glue in plain JAX, hot paths in Pallas)
# ----------------------------------------------------------------------------
def init_cross_attention_params(key, dim, heads, dim_head):
    inner_dim = dim_head * heads
    k1, k2, k3, k4 = jax.random.split(key, 4)
    s_q = 1.0 / math.sqrt(dim)
    params = {
        "w_q": jax.random.uniform(k1, (dim, inner_dim), jnp.float32, -s_q, s_q),
        "w_kv": jax.random.uniform(k2, (dim, 2 * inner_dim), jnp.float32, -s_q, s_q),
    }
    project_out = not (heads == 1 and dim_head == dim)
    if project_out:
        s_o = 1.0 / math.sqrt(inner_dim)
        params["w_out"] = jax.random.uniform(
            k3, (inner_dim, dim), jnp.float32, -s_o, s_o
        )
        params["b_out"] = jax.random.uniform(k4, (dim,), jnp.float32, -s_o, s_o)
    return params


def cross_attention_forward(params, x_q, x_kv, heads, dim_head,
                            compute_dtype=jnp.float32):
    B, Nq, dim = x_q.shape
    _, Nkv, dim_large = x_kv.shape
    assert dim == dim_large
    inner_dim = heads * dim_head
    scale = dim_head ** (-0.5)

    cd = compute_dtype
    xq2 = x_q.reshape(B * Nq, dim).astype(cd)
    xkv2 = x_kv.reshape(B * Nkv, dim).astype(cd)

    # Fold the softmax scale into the Q weight (weight-sized, free) so the
    # attention kernel never scales the (Nq, Nkv) score block.
    w_q = (params["w_q"] * scale).astype(cd)
    # Split the fused KV weight once (weight-sized, one-off) so the large
    # (B*Nkv, 2*inner) activation is never materialized and re-sliced in HBM.
    w_k = params["w_kv"][:, :inner_dim].astype(cd)
    w_v = params["w_kv"][:, inner_dim:].astype(cd)

    # --- projections (tiled Pallas matmuls), kept in 'b n (h d)' layout ---
    q = pallas_matmul(xq2, w_q).reshape(B, Nq, inner_dim)
    k, v = pallas_matmul_kv(xkv2, w_k, w_v)   # x_kv streamed from HBM once
    k = k.reshape(B, Nkv, inner_dim)
    v = v.reshape(B, Nkv, inner_dim)

    # --- flash-style attention core (lane-dense 'b n (h d)' output) ---
    out = pallas_attention(q, k, v, heads=heads, dim_head=dim_head)

    # --- output projection + bias; Dropout is identity in eval ---
    if "w_out" in params:
        out = pallas_matmul(
            out.reshape(B * Nq, inner_dim),
            params["w_out"].astype(cd),
            bias=params["b_out"],
            out_dtype=jnp.float32,
        ).reshape(B, Nq, dim)
    else:
        out = out.astype(jnp.float32)
    return out


# ----------------------------------------------------------------------------
# Pure-JAX reference for correctness check
# ----------------------------------------------------------------------------
def cross_attention_reference(params, x_q, x_kv, heads, dim_head):
    B, Nq, dim = x_q.shape
    _, Nkv, _ = x_kv.shape
    inner_dim = dim_head * heads
    scale = dim_head ** (-0.5)
    q = x_q @ params["w_q"]
    kv = x_kv @ params["w_kv"]
    k, v = kv[..., :inner_dim], kv[..., inner_dim:]
    rh = lambda t, n: t.reshape(B, n, heads, dim_head).transpose(0, 2, 1, 3)
    q, k, v = rh(q, Nq), rh(k, Nkv), rh(v, Nkv)
    dots = jnp.einsum("bhid,bhjd->bhij", q, k) * scale
    attn = jax.nn.softmax(dots, axis=-1)
    out = jnp.einsum("bhij,bhjd->bhid", attn, v)
    out = out.transpose(0, 2, 1, 3).reshape(B, Nq, inner_dim)
    if "w_out" in params:
        out = out @ params["w_out"] + params["b_out"]
    return out


if __name__ == "__main__":
    # Small shapes consistent with the module's forward.
    B, Nq, Nkv = 2, 8, 16
    dim, heads, dim_head = 32, 4, 8

    key = jax.random.PRNGKey(0)
    kp, kq, kk = jax.random.split(key, 3)
    params = init_cross_attention_params(kp, dim, heads, dim_head)
    x_q = jax.random.normal(kq, (B, Nq, dim), jnp.float32)
    x_kv = jax.random.normal(kk, (B, Nkv, dim), jnp.float32)

    ref = cross_attention_reference(params, x_q, x_kv, heads, dim_head)

    # f32 MXU path (approx reciprocal in softmax -> slightly loose tolerance).
    out = cross_attention_forward(params, x_q, x_kv, heads, dim_head,
                                  compute_dtype=jnp.float32)
    out = jax.block_until_ready(out)
    assert out.shape == (B, Nq, dim), out.shape
    assert jnp.allclose(out, ref, atol=5e-3, rtol=5e-3), "f32 path mismatch"

    # bf16-for-MXU path (v6e/v7x fast path); f32 accumulation + f32 softmax.
    # Note: activations AND weights are cast to bf16 (intentional; documented).
    out_bf16 = cross_attention_forward(params, x_q, x_kv, heads, dim_head,
                                       compute_dtype=jnp.bfloat16)
    out_bf16 = jax.block_until_ready(out_bf16)
    assert jnp.allclose(out_bf16, ref, atol=7e-2, rtol=7e-2), "bf16 path mismatch"

    print("KERNEL_OK")
</pallas_src>

<mosaic_0001>
module attributes {stable_mosaic.version = 11 : i64} {
  func.func @_matmul_kernel(%arg0: i32, %arg1: i32, %arg2: i32, %arg3: memref<16x32xf32, #tpu.memory_space<vmem>>, %arg4: memref<32x32xf32, #tpu.memory_space<vmem>>, %arg5: memref<16x32xf32, #tpu.memory_space<vmem>>, %arg6: memref<16x32xf32, #tpu.memory_space<vmem>>) attributes {dimension_semantics = [#tpu.dimension_semantics<parallel>, #tpu.dimension_semantics<parallel>, #tpu.dimension_semantics<arbitrary>], iteration_bounds = array<i64: 1, 1, 1>, scalar_prefetch = 0 : i64, scratch_operands = 1 : i64, tpu.core_type = #tpu.core_type<tc>, window_params = [{transform_indices = @transform_0, window_bounds = array<i64: 16, 32>}, {transform_indices = @transform_1, window_bounds = array<i64: 32, 32>}, {transform_indices = @transform_2, window_bounds = array<i64: 16, 32>}]} {
    %c0_i32 = arith.constant 0 : i32
    %0 = arith.cmpi eq, %arg2, %c0_i32 : i32
    %1 = arith.extui %0 : i1 to i32
    %c0_i32_0 = arith.constant 0 : i32
    %2 = arith.cmpi ne, %1, %c0_i32_0 : i32
    scf.if %2 {
      %cst_10 = arith.constant 0.000000e+00 : f32
      %12 = vector.broadcast %cst_10 : f32 to vector<16x32xf32>
      %c0_11 = arith.constant 0 : index
      %c0_12 = arith.constant 0 : index
      %13 = vector.load %arg6[%c0_11, %c0_12] : memref<16x32xf32, #tpu.memory_space<vmem>>, vector<16x32xf32>
      tpu.vector_store %arg6[%c0_11, %c0_12], %12 {strides = array<i32>} : memref<16x32xf32, #tpu.memory_space<vmem>>, vector<16x32xf32>,
    } else {
    }
    %c0 = arith.constant 0 : index
    %c0_1 = arith.constant 0 : index
    %3 = vector.load %arg6[%c0, %c0_1] : memref<16x32xf32, #tpu.memory_space<vmem>>, vector<16x32xf32>
    %c0_2 = arith.constant 0 : index
    %c0_3 = arith.constant 0 : index
    %4 = vector.load %arg3[%c0_2, %c0_3] : memref<16x32xf32, #tpu.memory_space<vmem>>, vector<16x32xf32>
    %c0_4 = arith.constant 0 : index
    %c0_5 = arith.constant 0 : index
    %5 = vector.load %arg4[%c0_4, %c0_5] : memref<32x32xf32, #tpu.memory_space<vmem>>, vector<32x32xf32>
    %cst = arith.constant dense<0.000000e+00> : vector<16x32xf32>
    %6 = tpu.matmul %4, %5, %cst {dimension_numbers = #tpu.dot_dimension_numbers<[1], [0], [0], [1], [0, 0, 1, 1], [], []>} : vector<16x32xf32>, vector<32x32xf32>, vector<16x32xf32> -> vector<16x32xf32>
    %7 = arith.addf %3, %6 : vector<16x32xf32>
    %c0_6 = arith.constant 0 : index
    %c0_7 = arith.constant 0 : index
    %8 = vector.load %arg6[%c0_6, %c0_7] : memref<16x32xf32, #tpu.memory_space<vmem>>, vector<16x32xf32>
    tpu.vector_store %arg6[%c0_6, %c0_7], %7 {strides = array<i32>} : memref<16x32xf32, #tpu.memory_space<vmem>>, vector<16x32xf32>,
    %c0_i32_8 = arith.constant 0 : i32
    %9 = arith.cmpi eq, %arg2, %c0_i32_8 : i32
    %10 = arith.extui %9 : i1 to i32
    %c0_i32_9 = arith.constant 0 : i32
    %11 = arith.cmpi ne, %10, %c0_i32_9 : i32
    scf.if %11 {
      %c0_10 = arith.constant 0 : index
      %c0_11 = arith.constant 0 : index
      %12 = vector.load %arg6[%c0_10, %c0_11] : memref<16x32xf32, #tpu.memory_space<vmem>>, vector<16x32xf32>
      %c0_12 = arith.constant 0 : index
      %c0_13 = arith.constant 0 : index
      %13 = vector.load %arg5[%c0_12, %c0_13] : memref<16x32xf32, #tpu.memory_space<vmem>>, vector<16x32xf32>
      tpu.vector_store %arg5[%c0_12, %c0_13], %12 {strides = array<i32>} : memref<16x32xf32, #tpu.memory_space<vmem>>, vector<16x32xf32>,
    } else {
    }
    return
  }
  func.func @transform_0(%arg0: i32, %arg1: i32, %arg2: i32) -> (i32, i32) {
    %c0_i32 = arith.constant 0 : i32
    return %arg0, %arg2 : i32, i32
  }
  func.func @transform_1(%arg0: i32, %arg1: i32, %arg2: i32) -> (i32, i32) {
    %c0_i32 = arith.constant 0 : i32
    return %arg2, %arg1 : i32, i32
  }
  func.func @transform_2(%arg0: i32, %arg1: i32, %arg2: i32) -> (i32, i32) {
    %c0_i32 = arith.constant 0 : i32
    return %arg0, %arg1 : i32, i32
  }
}

</mosaic_0001>

<bundles_post_ra>
// kernel: tpu_custom_call.1
= control target key start
LH: loop header
LB: loop body
LE: loop exit
PB: predicated region body
PF: predicated region fallthrough
CT: control target
= control target key end

     0   :  { %7 = vsyncpa [#allocation4], 0  ;;  %s345_s0 = inlined_call_operand.hbm [shape: f32[16,32], index: 0, kind: input, shape index: {}]   ;;  %s346_s1 = inlined_call_operand.hbm [shape: f32[32,32], index: 1, kind: input, shape index: {}]   ;;  %s347_s2 = inlined_call_operand.hbm [shape: f32[16,32], index: 2, kind: output, shape index: {}]  }
   0x1   :  { %8 = vsyncpa [#allocation7], 0 }
   0x2   :  { %9 = vsyncpa [#allocation5], 0  ;;  %s271_s9 = smov [#allocation3]   ;;  %s199_s13 = scalar_lea.hbm %s345_s0, 256 }
   0x3   :  { %s15_s10 = sshll.u32 %s271_s9, 4  ;;  %p200_p0 = scmp.ne.s32.totalorder %s345_s0, %s199_s13  ;;  %s16_s10 = int_to_ptr.vmem [resolvable:$true] %s15_s10 }
   0x4   :  { %p203_p1 = scmp.lt.u32.totalorder %s199_s13, %s345_s0 }
   0x6   :  { %p205_p2 = pnand %p203_p1, %p200_p0 }
   0x8   :  { %208 = shalt.err (!%p205_p2)
}
   0x9   :  { %s209_s18 = scalar_lea.vmem %s16_s10, 256  ;;  %p214_p4 = scmp.lt.s32.totalorder %s16_s10, %s16_s10 }
   0xa   :  { %p210_p3 = scmp.ne.s32.totalorder %s16_s10, %s209_s18  ;;  %p215_p5 = scmp.lt.s32.totalorder %s209_s18, %s209_s18 }
   0xc   :  { %p216_p6 = por %p215_p5, %p214_p4 }
   0xe   :  { %p217_p7 = pnand %p216_p6, %p210_p3 }
  0x10   :  { %220 = shalt.err (!%p217_p7)
}
  0x11   :  { %s272_s19 = smov 128   ;;  %s273_s20 = smov 8  }
  0x12   :  { %21 = dma.hbm_to_vmem [thread:$0]  %s345_s0, 256, %s16_s10, [#allocation4], %s272_s19, %s272_s19, %s273_s20  }
  0x13   :  { %s274_s23 = smov [#allocation6]   ;;  %s221_s27 = scalar_lea.hbm %s346_s1, 512 }
  0x14   :  { %s27_s24 = sshll.u32 %s274_s23, 4  ;;  %p222_p8 = scmp.ne.s32.totalorder %s346_s1, %s221_s27  ;;  %s28_s24 = int_to_ptr.vmem [resolvable:$true] %s27_s24 }
  0x15   :  { %p225_p9 = scmp.lt.u32.totalorder %s221_s27, %s346_s1 }
  0x17   :  { %p227_p10 = pnand %p225_p9, %p222_p8 }
  0x19   :  { %230 = shalt.err (!%p227_p10)
}
  0x1a   :  { %s231_s4 = scalar_lea.vmem %s28_s24, 512  ;;  %p236_p12 = scmp.lt.s32.totalorder %s28_s24, %s28_s24 }
  0x1b   :  { %p232_p11 = scmp.ne.s32.totalorder %s28_s24, %s231_s4  ;;  %p237_p13 = scmp.lt.s32.totalorder %s231_s4, %s231_s4 }
  0x1d   :  { %p238_p0 = por %p237_p13, %p236_p12 }
  0x1f   :  { %p239_p1 = pnand %p238_p0, %p232_p11 }
  0x21   :  { %242 = shalt.err (!%p239_p1)
}
  0x22   :  { %33 = dma.hbm_to_vmem [thread:$0]  %s346_s1, 512, %s28_s24, [#allocation7], %s272_s19, %s272_s19, %s273_s20  }
  0x23   :  { %265 = dma.done.wait [#allocation4], 256  }
  0x24   :  { %266 = vsyncadd [#allocation4], 4294967040 }
  0x25   :  { %267 = dma.done.wait [#allocation7], 512  }
  0x26   :  { %268 = vsyncadd [#allocation7], 4294966784  ;;  %vm44_vm0 = vcmask 261120   ;;  %v275_v0 = vmov 0.0   ;;  %v51_v1 = vld [vmem:[#allocation6] sm:$0xff]  ;;  %v52_v2 = vld [vmem:[#allocation6 + $0x8] sm:$0xff] }
  0x27   :  { %46 = vst.msk [vmem:[#allocation2 + $0x8] sm:$0xff] %vm44_vm0, %v275_v0  ;;  %45 = vst.msk [vmem:[#allocation2] sm:$0xff] %vm44_vm0, %v275_v0  ;;  %v53_v3 = vld [vmem:[#allocation6 + $0x10] sm:$0xff]  ;;  %v185_v4 = vpack.c.bf16 %v52_v2, %v51_v1  ;;  %v54_v5 = vld [vmem:[#allocation6 + $0x18] sm:$0xff]  ;;  %s276_s1 = smov [#allocation8]  }
  0x28   :  { %v49_v6 = vld [vmem:[#allocation3] sm:$0xff]  ;;  %v189_v7 = vpack.c.bf16 %v54_v5, %v53_v3  ;;  %v50_v8 = vld [vmem:[#allocation3 + $0x8] sm:$0xff]  ;;  %s153_s6 = sshll.u32 %s276_s1, 4  ;;  %s154_s6 = int_to_ptr.vmem [resolvable:$true] %s153_s6 }
  0x29   :  { %182 = vmatprep.mubr.msk.f32.mxu0 %vm44_vm0, %v49_v6  ;;  %186 = vmatprep.subr.bf16.mxu0 %v185_v4  ;;  %s243_s7 = scalar_lea.vmem %s154_s6, 256  ;;  %p248_p3 = scmp.lt.s32.totalorder %s154_s6, %s154_s6 }
  0x2a   :  { %188 = vmatpush3.bf16.msra.mxu0 %v185_v4  ;;  %p244_p2 = scmp.ne.s32.totalorder %s154_s6, %s243_s7  ;;  %p249_p4 = scmp.lt.s32.totalorder %s243_s7, %s243_s7 }
  0x2b   :  { %190 = vmatprep.subr.bf16.mxu0 %v189_v7 }
  0x2c   :  { %p250_p5 = por %p249_p4, %p248_p3 }
  0x2e   :  { %192 = vmatpush3.bf16.msra.mxu0 %v189_v7  ;;  %v48_v9 = vld [vmem:[#allocation2 + $0x8] sm:$0xff]  ;;  %v47_v10 = vld [vmem:[#allocation2] sm:$0xff]  ;;  %p251_p6 = pnand %p250_p5, %p244_p2 }
  0x31   :  { %183 = vmatmul.mubr.msk.f32.vlgmr.msra.gmra.mrb[0].mxu0 %vm44_vm0, %v50_v8 }
 0x104   :  { %v184_v11 = vpop.f32.mrb[0].mxu0 }
 0x105   :  { %v138_v12 = vadd.f32 %v184_v11, %v48_v9  ;;  %v128_v13 = vpop.f32.mrb[1].mxu0 }
 0x106   :  { %v137_v14 = vadd.f32 %v128_v13, %v47_v10 }
 0x107   :  { %140 = vst.msk [vmem:[#allocation2 + $0x8] sm:$0xff] %vm44_vm0, %v138_v12 }
 0x108   :  { %139 = vst.msk [vmem:[#allocation2] sm:$0xff] %vm44_vm0, %v137_v14 }
 0x10e   :  { %v145_v15 = vld [vmem:[#allocation2 + $0x8] sm:$0xff] }
 0x10f   :  { %v144_v16 = vld [vmem:[#allocation2] sm:$0xff]  ;;  %147 = vst.msk [vmem:[#allocation8 + $0x8] sm:$0xff] %vm44_vm0, %v145_v15 }
 0x110   :  { %146 = vst.msk [vmem:[#allocation8] sm:$0xff] %vm44_vm0, %v144_v16 }
 0x111   :  { %254 = shalt.err (!%p251_p6)
}
 0x112   :  { %s255_s10 = scalar_lea.hbm %s347_s2, 256 }
 0x113   :  { %p256_p7 = scmp.ne.s32.totalorder %s347_s2, %s255_s10  ;;  %p259_p8 = scmp.lt.u32.totalorder %s255_s10, %s347_s2 }
 0x115   :  { %p261_p9 = pnand %p259_p8, %p256_p7 }
 0x117   :  { %264 = shalt.err (!%p261_p9)
}
 0x118   :  { %159 = dma.vmem_to_hbm [thread:$0]  %s154_s6, 256, %s347_s2, [#allocation5], %s272_s19, %s272_s19, %s273_s20  }
 0x119   :  { %269 = dma.done.wait [#allocation5], 256  }
 0x11a   :  { %270 = vsyncadd [#allocation5], 4294967040 }
 0x11b   :  { %163 = vsyncpa [#allocation4], 1 }
 0x11c   :  { %164 = vsyncpa [#allocation7], 1 }
 0x11d   :  { %165 = vsyncpa [#allocation5], 1 }

</bundles_post_ra>
